<compile_context>
chip_gen: v5e
topology: v5e:2x2
jax: 0.10.0
libtpu: 0.0.40
codegen_flags: <defaults>
</compile_context>

<pallas_src>
import math

import jax
import jax.numpy as jnp
from jax.experimental import pallas as pl
from jax.experimental.pallas import tpu as pltpu


def _round_up(x, m):
    return ((x + m - 1) // m) * m


def _clamp_vmem(nbytes, lo=16 << 20, hi=64 << 20):
    """Explicit scoped-VMEM limit: measured need + headroom, clamped to a
    range that is portable across v5e / v6e (128 MiB) and v7x (64 MiB)."""
    return int(max(lo, min(hi, 2 * nbytes)))


# ---------------------------------------------------------------------------
# Kernel A: self-loop transform   init[n] = feat[n] @ W_uu[n] + B_uu[n]
# (node-tiled, runs once; its output seeds the streaming kernel's accumulator)
# ---------------------------------------------------------------------------
def self_loop_kernel(feat_ref, w_uu_ref, b_uu_ref, out_ref):
    tN, Fin = feat_ref.shape
    Fout = out_ref.shape[1]
    # bf16 inputs straight into the MXU, f32 accumulate.
    loop = jnp.einsum('ntf,nfo->nto',
                      feat_ref[...].reshape(tN, 1, Fin), w_uu_ref[...],
                      preferred_element_type=jnp.float32)       # (tN, 1, Fout)
    out_ref[...] = loop.reshape(tN, Fout) + b_uu_ref[...]


# ---------------------------------------------------------------------------
# Kernel B: edge streaming — per-edge message + scatter-add into the resident
# (N, Fout) f32 output accumulator.  Grid = (n_edge_tiles,), "arbitrary".
# ---------------------------------------------------------------------------
def edge_scatter_kernel(dst_ref, feat_src_ref, w_uv_ref, b_uv_ref, init_ref,
                        out_ref):
    ei = pl.program_id(0)
    tE, Fin, Fout = w_uv_ref.shape
    N = out_ref.shape[0]

    # First edge tile: seed the resident accumulator with loop + B_uu.
    @pl.when(ei == 0)
    def _():
        out_ref[...] = init_ref[...]

    # Per-edge message: msg[e] = feat[src[e]] @ W_uv[e] + B_uv[e]
    # bf16 x bf16 on the MXU, f32 accumulate (exact for bf16-rounded inputs).
    msg = jnp.einsum('etf,efo->eto',
                     feat_src_ref[...].reshape(tE, 1, Fin), w_uv_ref[...],
                     preferred_element_type=jnp.float32)        # (tE, 1, Fout)
    msg = msg.reshape(tE, Fout) + b_uv_ref[...]                 # (tE, Fout) f32

    # Scatter-add over the edge axis via an exact one-hot matmul.
    # Padded edges carry dst == -1 and therefore match no node row.
    dst_row = dst_ref[0]                                        # (1, tE) int32
    node_ids = jax.lax.broadcasted_iota(jnp.int32, (N, tE), 0)  # (N, tE)
    dst_oh = (dst_row == node_ids).astype(jnp.float32)          # (N, tE) 0/1
    out_ref[...] += jnp.dot(dst_oh, msg,
                            preferred_element_type=jnp.float32)  # (N, Fout)


def gnn_layer_forward(feat, W_uv, W_uu, B_uv, B_uu, src, dst,
                      *, node_tile=None, edge_tile=None):
    """feat: (N, F_in) (or (N, 1, F_in)).  Returns the squeezed (N, F_out) output."""
    if feat.ndim == 3:
        if feat.shape[1] != 1:
            # TODO(synk): T > 1 feature path not implemented.
            raise NotImplementedError("only T == 1 node features are supported")
        feat = feat[:, 0, :]
    N, Fin = feat.shape
    E, _, Fout = W_uv.shape

    f32, bf16 = jnp.float32, jnp.bfloat16

    # ---- tile sizes + padding (pad instead of full-extent fallback) --------
    tN = node_tile if node_tile is not None else 128
    tN = min(_round_up(tN, 8), _round_up(N, 8))
    N_pad = _round_up(N, tN)
    n_node_tiles = N_pad // tN

    tE = edge_tile if edge_tile is not None else 256     # big tiles -> efficient DMA
    tE = min(_round_up(tE, 8), _round_up(E, 8))
    E_pad = _round_up(E, tE)
    n_edge_tiles = E_pad // tE

    # ---- bf16 storage for the big operands; f32 biases ----------------------
    feat_bf = feat.astype(bf16)
    feat_p = jnp.zeros((N_pad, Fin), bf16).at[:N].set(feat_bf)
    w_uu_p = jnp.zeros((N_pad, Fin, Fout), bf16).at[:N].set(W_uu.astype(bf16))
    b_uu_p = jnp.zeros((N_pad, Fout), f32).at[:N].set(B_uu.reshape(N, Fout).astype(f32))

    # Pre-gathered source features (cheap XLA gather; E*Fin*2 B of extra HBM
    # traffic, negligible vs the E*Fin*Fout*2 B W_uv stream).
    feat_src = feat_bf[src.astype(jnp.int32)]
    feat_src_p = jnp.zeros((E_pad, Fin), bf16).at[:E].set(feat_src)
    w_uv_p = jnp.zeros((E_pad, Fin, Fout), bf16).at[:E].set(W_uv.astype(bf16))
    b_uv_p = jnp.zeros((E_pad, Fout), f32).at[:E].set(B_uv.reshape(E, Fout).astype(f32))
    dst_p = jnp.full((E_pad,), -1, jnp.int32).at[:E].set(dst.astype(jnp.int32))
    dst3 = dst_p.reshape(n_edge_tiles, 1, tE)

    # ---- Kernel A: self-loop init (loop + B_uu) ------------------------------
    loop_vmem = 2 * (tN * Fin * 2 + tN * Fin * Fout * 2 + 2 * tN * Fout * 4)
    init = pl.pallas_call(
        self_loop_kernel,
        out_shape=jax.ShapeDtypeStruct((N_pad, Fout), f32),
        grid_spec=pltpu.PrefetchScalarGridSpec(
            num_scalar_prefetch=0,
            grid=(n_node_tiles,),
            in_specs=[
                pl.BlockSpec((tN, Fin), lambda ni: (ni, 0)),
                pl.BlockSpec((tN, Fin, Fout), lambda ni: (ni, 0, 0)),
                pl.BlockSpec((tN, Fout), lambda ni: (ni, 0)),
            ],
            out_specs=pl.BlockSpec((tN, Fout), lambda ni: (ni, 0)),
        ),
        compiler_params=pltpu.CompilerParams(
            dimension_semantics=("parallel",),
            vmem_limit_bytes=_clamp_vmem(loop_vmem)),
    )(feat_p, w_uu_p, b_uu_p)

    # ---- Kernel B: single pass over W_uv, resident (N, Fout) accumulator ----
    edge_vmem = (2 * (tE * Fin * Fout * 2      # W_uv tile (double-buffered)
                      + tE * Fin * 2           # gathered src features
                      + tE * Fout * 4          # B_uv
                      + tE * 4)                # dst ids
                 + 2 * N_pad * Fout * 4        # init (constant block index)
                 + 2 * N_pad * Fout * 4        # resident output accumulator
                 + N_pad * tE * 4)             # one-hot temporary
    flops = 2 * E_pad * Fin * Fout + 2 * N_pad * E_pad * Fout
    bytes_accessed = (E_pad * Fin * Fout * 2 + E_pad * Fin * 2
                      + E_pad * Fout * 4 + E_pad * 4 + 2 * N_pad * Fout * 4)

    out = pl.pallas_call(
        edge_scatter_kernel,
        out_shape=jax.ShapeDtypeStruct((N_pad, Fout), f32),
        grid_spec=pltpu.PrefetchScalarGridSpec(
            num_scalar_prefetch=0,
            grid=(n_edge_tiles,),
            in_specs=[
                pl.BlockSpec((1, 1, tE), lambda ei: (ei, 0, 0)),       # dst ids
                pl.BlockSpec((tE, Fin), lambda ei: (ei, 0)),           # feat[src] tile
                pl.BlockSpec((tE, Fin, Fout), lambda ei: (ei, 0, 0)),  # W_uv tile
                pl.BlockSpec((tE, Fout), lambda ei: (ei, 0)),          # B_uv tile
                pl.BlockSpec((N_pad, Fout), lambda ei: (0, 0)),        # init (constant)
            ],
            out_specs=pl.BlockSpec((N_pad, Fout), lambda ei: (0, 0)),  # resident acc
        ),
        compiler_params=pltpu.CompilerParams(
            dimension_semantics=("arbitrary",),
            vmem_limit_bytes=_clamp_vmem(edge_vmem)),
        cost_estimate=pl.CostEstimate(flops=int(flops), transcendentals=0,
                                      bytes_accessed=int(bytes_accessed)),
    )(dst3, feat_src_p, w_uv_p, b_uv_p, init)

    # Drop node padding and mirror the module's `.squeeze()`.
    return jnp.squeeze(out[:N])


def gnn_layer_ref(feat, W_uv, W_uu, B_uv, B_uu, src, dst):
    """Pure-JAX reference (mirrors the PyTorch/DGL semantics)."""
    feat3 = feat[:, None, :] if feat.ndim == 2 else feat
    N = feat3.shape[0]
    loop = jnp.einsum('ntf,nfo->nto', feat3, W_uu)
    msg = jnp.einsum('etf,efo->eto', feat3[src], W_uv) + B_uv
    agg = jax.ops.segment_sum(msg, dst, num_segments=N)
    return jnp.squeeze(agg + B_uu + loop)


if __name__ == "__main__":
    # Deterministic synthetic graph: 16 nodes, 48 directed edges
    # (ring i->i+1 plus chords i->i+3 and i->i+5).  Fin = Fout = 128 keeps
    # the output lane-dense.  Small node/edge tiles are used only to exercise
    # the multi-tile grid paths; real runs should use tiles >= 128.
    num_nodes, num_edges = 16, 48
    in_feat, out_feat = 128, 128

    src = jnp.array(list(range(num_nodes)) * 3, dtype=jnp.int32)
    dst = jnp.array([(i + 1) % num_nodes for i in range(num_nodes)]
                    + [(i + 3) % num_nodes for i in range(num_nodes)]
                    + [(i + 5) % num_nodes for i in range(num_nodes)], dtype=jnp.int32)

    key = jax.random.PRNGKey(0)
    k_uv, k_uu, k_buv, k_buu, k_feat = jax.random.split(key, 5)

    # Same distributions as the module's _reset_parameters for the weights.
    bound_uv = 1.0 / math.sqrt(in_feat)
    W_uv = jax.random.uniform(k_uv, (num_edges, in_feat, out_feat),
                              jnp.float32, -bound_uv, bound_uv)
    gain = 5.0 / 3.0                           # nn.init.calculate_gain('tanh')
    fan_in = in_feat * out_feat                # PyTorch fan rules for a 3-D tensor
    fan_out = num_nodes * out_feat
    xav_bound = gain * math.sqrt(6.0 / (fan_in + fan_out))
    W_uu = jax.random.uniform(k_uu, (num_nodes, in_feat, out_feat),
                              jnp.float32, -xav_bound, xav_bound)
    # The module inits the biases to zero; use small random values here so the
    # bias-add paths are actually exercised by the correctness check.
    B_uv = 0.1 * jax.random.normal(k_buv, (num_edges, 1, out_feat), jnp.float32)
    B_uu = 0.1 * jax.random.normal(k_buu, (num_nodes, 1, out_feat), jnp.float32)

    feat = jax.random.normal(k_feat, (num_nodes, in_feat), jnp.float32)

    out = gnn_layer_forward(feat, W_uv, W_uu, B_uv, B_uu, src, dst,
                            node_tile=8, edge_tile=16)
    out = jax.block_until_ready(out)

    # Reference on the same bf16-rounded feat / weights the kernel consumes.
    q = lambda x: x.astype(jnp.bfloat16).astype(jnp.float32)
    ref = gnn_layer_ref(q(feat), q(W_uv), q(W_uu), B_uv, B_uu, src, dst)

    assert out.shape == ref.shape == (num_nodes, out_feat), (out.shape, ref.shape)
    max_err = float(jnp.max(jnp.abs(out - ref)))
    assert jnp.allclose(out, ref, rtol=1e-3, atol=1e-3), max_err

    print("KERNEL_OK")
</pallas_src>

<mosaic_0001>
module attributes {stable_mosaic.version = 11 : i64} {
  func.func @self_loop_kernel(%arg0: i32, %arg1: memref<8x128xbf16, #tpu.memory_space<vmem>>, %arg2: memref<8x128x128xbf16, #tpu.memory_space<vmem>>, %arg3: memref<8x128xf32, #tpu.memory_space<vmem>>, %arg4: memref<8x128xf32, #tpu.memory_space<vmem>>) attributes {dimension_semantics = [#tpu.dimension_semantics<parallel>], iteration_bounds = array<i64: 2>, scalar_prefetch = 0 : i64, scratch_operands = 0 : i64, tpu.core_type = #tpu.core_type<tc>, window_params = [{transform_indices = @transform_0, window_bounds = array<i64: 8, 128>}, {transform_indices = @transform_1, window_bounds = array<i64: 8, 128, 128>}, {transform_indices = @transform_2, window_bounds = array<i64: 8, 128>}, {transform_indices = @transform_3, window_bounds = array<i64: 8, 128>}]} {
    %c0 = arith.constant 0 : index
    %c0_0 = arith.constant 0 : index
    %0 = vector.load %arg1[%c0, %c0_0] : memref<8x128xbf16, #tpu.memory_space<vmem>>, vector<8x128xbf16>
    %1 = vector.shape_cast %0 : vector<8x128xbf16> to vector<8x1x128xbf16>
    %c0_1 = arith.constant 0 : index
    %c0_2 = arith.constant 0 : index
    %c0_3 = arith.constant 0 : index
    %2 = vector.load %arg2[%c0_1, %c0_2, %c0_3] : memref<8x128x128xbf16, #tpu.memory_space<vmem>>, vector<8x128x128xbf16>
    "tpu.trace_start"() <{level = 10 : i32, message = "ntf,nfo->nto"}> : () -> ()
    %cst = arith.constant dense<0.000000e+00> : vector<8x1x128xf32>
    %3 = tpu.matmul %1, %2, %cst {dimension_numbers = #tpu.dot_dimension_numbers<[2], [1], [1], [2], [0, 0, 0, 1, 1, 2], [0], [0]>} : vector<8x1x128xbf16>, vector<8x128x128xbf16>, vector<8x1x128xf32> -> vector<8x1x128xf32>
    "tpu.trace_stop"() : () -> ()
    %4 = vector.shape_cast %3 : vector<8x1x128xf32> to vector<8x128xf32>
    %c0_4 = arith.constant 0 : index
    %c0_5 = arith.constant 0 : index
    %5 = vector.load %arg3[%c0_4, %c0_5] : memref<8x128xf32, #tpu.memory_space<vmem>>, vector<8x128xf32>
    %6 = arith.addf %4, %5 : vector<8x128xf32>
    %c0_6 = arith.constant 0 : index
    %c0_7 = arith.constant 0 : index
    %7 = vector.load %arg4[%c0_6, %c0_7] : memref<8x128xf32, #tpu.memory_space<vmem>>, vector<8x128xf32>
    tpu.vector_store %arg4[%c0_6, %c0_7], %6 {strides = array<i32>} : memref<8x128xf32, #tpu.memory_space<vmem>>, vector<8x128xf32>,
    return
  }
  func.func @transform_0(%arg0: i32) -> (i32, i32) {
    %c0_i32 = arith.constant 0 : i32
    %c0_i32_0 = arith.constant 0 : i32
    return %arg0, %c0_i32 : i32, i32
  }
  func.func @transform_1(%arg0: i32) -> (i32, i32, i32) {
    %c0_i32 = arith.constant 0 : i32
    %c0_i32_0 = arith.constant 0 : i32
    %c0_i32_1 = arith.constant 0 : i32
    return %arg0, %c0_i32, %c0_i32_0 : i32, i32, i32
  }
  func.func @transform_2(%arg0: i32) -> (i32, i32) {
    %c0_i32 = arith.constant 0 : i32
    %c0_i32_0 = arith.constant 0 : i32
    return %arg0, %c0_i32 : i32, i32
  }
  func.func @transform_3(%arg0: i32) -> (i32, i32) {
    %c0_i32 = arith.constant 0 : i32
    %c0_i32_0 = arith.constant 0 : i32
    return %arg0, %c0_i32 : i32, i32
  }
}

</mosaic_0001>

<bundles_post_ra>
// kernel: tpu_custom_call.1
= control target key start
LH: loop header
LB: loop body
LE: loop exit
PB: predicated region body
PF: predicated region fallthrough
CT: control target
= control target key end

     0   :  { %s1974_s0 = inlined_call_operand.hbm [shape: bf16[16,128], index: 0, kind: input, shape index: {}]   ;;  %s1975_s1 = inlined_call_operand.hbm [shape: bf16[16,128,128], index: 1, kind: input, shape index: {}]   ;;  %s1976_s2 = inlined_call_operand.hbm [shape: f32[16,128], index: 2, kind: input, shape index: {}]   ;;  %s1977_s3 = inlined_call_operand.hbm [shape: f32[16,128], index: 3, kind: output, shape index: {}]  }
   0x1   :  { %1978 = sst [smem:[#allocation13_spill]] %s1975_s1 }
   0x2   :  { %8 = vsyncpa [#allocation3], 0 }
   0x3   :  { %10 = vsyncpa [#allocation3 + $0x1], 0 }
   0x4   :  { %11 = vsyncpa [#allocation6], 0 }
   0x5   :  { %13 = vsyncpa [#allocation6 + $0x1], 0 }
   0x6   :  { %14 = vsyncpa [#allocation4], 0 }
   0x7   :  { %16 = vsyncpa [#allocation4 + $0x1], 0  ;;  %s1706_s12 = smov 0   ;;  %s1708_s13 = smov 0  }
   0x8   :  { %s1710_s14 = smov 0   ;;  %s1712_s15 = smov 0  }
   0x9 LB: > { %s1727_s16 = sadd.s32 4294967295, %s1682_s15   ;;  %s1118_s17 = sadd.s32 4294967294, %s1682_s15   ;;  %s1682_s15 = sphi %s1712_s15, %s1990_s15   ;;  %s1678_s14 = sphi %s1710_s14, %s1989_s14   ;;  %s1674_s13 = sphi %s1708_s13, %s1988_s13   ;;  %s1670_s12 = sphi %s1706_s12, %s1987_s12  }
   0xa   : > { %s1731_s18 = sadd.s32 1, %s1682_s15   ;;  %s29_s19 = sadd.s32 1, %s1678_s14 }
   0xb   : > { %s26_s20 = ssub.s32 %s1682_s15, %s1731_s18  ;;  %p36_p0 = scmp.ne.s32.totalorder %s1678_s14, %s1674_s13 }
   0xc   : > { %p27_p1 = scmp.eq.s32.totalorder %s26_s20, 0  ;;  %p37_p2 = scmp.eq.s32.totalorder %s1682_s15, 0 }
   0xd   : > { %p42_p3 = scmp.ne.s32.totalorder %s1674_s13, %s1670_s12  ;;  %p43_p4 = scmp.eq.s32.totalorder %s1727_s16, 0 }
   0xe   : > { %s1743_s21 = scalar_select %p27_p1, %s1678_s14, %s29_s19  }
   0xf   : > { %p38_p5 = por %p37_p2, %p36_p0  ;;  %p1745_p6 = por %p43_p4, %p42_p3 }
  0x10   : > { %1979 = sst [smem:[#allocation12_spill]] %s1743_s21  ;;  %p118_p7 = scmp.eq.s32.totalorder %s1727_s16, 1 }
  0x11   : > { %p124_p8 = scmp.eq.s32.totalorder %s1118_s17, 1  ;;  %p1120_p9 = scmp.ge.s32.totalorder %s1682_s15, 2 }
  0x12   : > { %p1486_p10 = scmp.lt.s32.totalorder %s1682_s15, 2  ;;  %p1752_p11 = por %p118_p7, %p36_p0 }
  0x13   : > { %p1756_p12 = por %p124_p8, %p42_p3  ;;  %s1761_s25 = sand.u32 1, %s1678_s14  }
  0x14   : > { %p1763_p13 = pnand %p1486_p10, %p38_p5  ;;  %s163_s27 = sand.u32 1, %s1682_s15  }
  0x15   : > { %s1123_s28 = sshll.u32 %s1761_s25, 9  ;;  %s1399_s29 = sshll.u32 %s1682_s15, 9 }
  0x16   : > { %s1984_s1 = sld [smem:[#allocation13_spill]]  ;;  %s167_s6 = scalar_lea.vmem [#allocation5], %s1123_s28 }
  0x17   : > { %s176_s7 = sshll.u32 %s167_s6, 4  ;;  %p1129_p0 = scmp.ge.s32.totalorder %s1682_s15, 1  ;;  %s177_s7 = int_to_ptr.vmem [resolvable:$true] %s176_s7 }
  0x18   : > { %s1774_s9 = scalar_lea.sflag [#allocation6], %s163_s27  ;;  %p1526_p2 = pneg %p1763_p13 }
  0x1c   : > { %s173_s5 = scalar_lea.hbm %s1984_s1, %s1399_s29  ;;  %s1529_s20 = scalar_lea.hbm %s1984_s1, 1024 }
  0x1d   : > { %s174_s8 = sshll.u32 %s173_s5, 4  ;;  %s175_s8 = int_to_ptr.hbm [resolvable:$true] %s174_s8 }
  0x1e   : > { %s1522_s10 = sshra.s32 %s175_s8, 4  ;;  %s1523_s10 = int_to_ptr.hbm [resolvable:$true] %s1522_s10 }
  0x1f   : > { %s1524_s11 = scalar_lea.hbm %s1523_s10, 512  ;;  %p1530_p5 = scmp.lt.s32.totalorder %s1523_s10, %s1984_s1 }
  0x20   : > { %p1525_p1 = scmp.ne.s32.totalorder %s1523_s10, %s1524_s11  ;;  %p1531_p7 = scmp.lt.s32.totalorder %s1529_s20, %s1524_s11 }
  0x22   : > { %p1527_p3 = pnand %p1526_p2, %p1525_p1  ;;  %p1532_p8 = por %p1531_p7, %p1530_p5 }
  0x24   : > { %p1528_p4 = pneg %p1527_p3 }
  0x26   : > { %p1533_p10 = pnand %p1532_p8, %p1528_p4 }
  0x28   : > { %1536 = shalt.err (!%p1533_p10)
}
  0x29   : > { %s1684_s27 = smov 64   ;;  %s1685_s30 = smov 4  }
  0x2a   : > { %1478 = dma.hbm_to_vmem [thread:$0]  (!%p1763_p13), %s175_s8, 8192, %s177_s7, %s1774_s9, %s1684_s27, %s1684_s27, %s1685_s30  }
  0x2b   : > { %p203_p1 = scmp.lt.s32.totalorder %s1682_s15, 3  ;;  %s1121_s4 = sshll.u32 %s1761_s25, 2 }
  0x2c   : > { %s1122_s5 = sshll.u32 %s1682_s15, 2  ;;  %s148_s19 = scalar_lea.vmem [#allocation2], %s1121_s4 }
  0x2d   : > { %p1795_p3 = pnand %p1129_p0, %p203_p1  ;;  %s152_s17 = scalar_lea.hbm %s1974_s0, %s1122_s5 }
  0x2e   : > { %s156_s20 = sshll.u32 %s148_s19, 4  ;;  %s154_s28 = sshll.u32 %s152_s17, 4  ;;  %s157_s20 = int_to_ptr.vmem [resolvable:$true] %s156_s20  ;;  %s155_s28 = int_to_ptr.hbm [resolvable:$true] %s154_s28 }
  0x2f   : > { %s1127_s29 = sshll.u32 %s1761_s25, 3  ;;  %s145_s7 = scalar_lea.sflag [#allocation3], %s1761_s25 }
  0x30   : > { %s1552_s8 = sshra.s32 %s155_s28, 4  ;;  %s1559_s10 = scalar_lea.hbm %s1974_s0, 8  ;;  %s1553_s8 = int_to_ptr.hbm [resolvable:$true] %s1552_s8 }
  0x31   : > { %s1554_s27 = scalar_lea.hbm %s1553_s8, 4  ;;  %p1560_p7 = scmp.lt.s32.totalorder %s1553_s8, %s1974_s0 }
  0x32   : > { %p1555_p4 = scmp.ne.s32.totalorder %s1553_s8, %s1554_s27  ;;  %p1561_p8 = scmp.lt.s32.totalorder %s1559_s10, %s1554_s27 }
  0x34   : > { %p1557_p0 = pnand %p1555_p4, %p1526_p2  ;;  %p1562_p10 = por %p1561_p8, %p1560_p7 }
  0x36   : > { %p1558_p5 = pneg %p1557_p0 }
  0x38   : > { %p1563_p1 = pnand %p1562_p10, %p1558_p5 }
  0x3a   : > { %1566 = shalt.err (!%p1563_p1)
}
  0x3b   : > { %1475 = dma.hbm_to_vmem [thread:$0]  (!%p1763_p13), %s155_s28, 64, %s157_s20, %s145_s7  }
  0x3c   : > { %s1128_s25 = sshll.u32 %s1682_s15, 3  ;;  %s190_s1 = scalar_lea.vmem [#allocation7], %s1127_s29 }
  0x3d   : > { %s194_s19 = scalar_lea.hbm %s1976_s2, %s1128_s25  ;;  %s198_s30 = sshll.u32 %s190_s1, 4  ;;  %s199_s30 = int_to_ptr.vmem [resolvable:$true] %s198_s30 }
  0x3e   : > { %s196_s21 = sshll.u32 %s194_s19, 4  ;;  %s1589_s28 = scalar_lea.hbm %s1976_s2, 16  ;;  %s197_s21 = int_to_ptr.hbm [resolvable:$true] %s196_s21 }
  0x3f   : > { %s1582_s8 = sshra.s32 %s197_s21, 4  ;;  %s1583_s8 = int_to_ptr.hbm [resolvable:$true] %s1582_s8 }
  0x40   : > { %s1584_s27 = scalar_lea.hbm %s1583_s8, 8  ;;  %p1590_p7 = scmp.lt.s32.totalorder %s1583_s8, %s1976_s2 }
  0x41   : > { %p1585_p4 = scmp.ne.s32.totalorder %s1583_s8, %s1584_s27  ;;  %p1591_p8 = scmp.lt.s32.totalorder %s1589_s28, %s1584_s27 }
  0x43   : > { %p1587_p0 = pnand %p1585_p4, %p1526_p2  ;;  %p1592_p10 = por %p1591_p8, %p1590_p7 }
  0x45   : > { %p1588_p5 = pneg %p1587_p0 }
  0x47   : > { %p1593_p1 = pnand %p1592_p10, %p1588_p5 }
  0x49   : > { %1596 = shalt.err (!%p1593_p1)
}
  0x4a   : > { %1481 = dma.hbm_to_vmem [thread:$0]  (!%p1763_p13), %s197_s21, 128, %s199_s30, %s1774_s9  }
  0x4b   : > { %207 = sbr.rel (%p1795_p3) target bundleno = 293 (0x125), region = 32  ;;  %s1834_s29 = sand.u32 (!%p1795_p3), 1, %s1674_s13  }
  0x4c   : > { %s1130_s4 = sshll.u32 (!%p1795_p3), %s1834_s29, 2  ;;  %s210_s25 = scalar_lea.sflag (!%p1795_p3), [#allocation3], %s1834_s29 }
  0x4d   : > { %s1838_s11 = scalar_lea.vmem (!%p1795_p3), [#allocation2], %s1130_s4 }
  0x50   : > { %1657 = dma.done.wait (%p1745_p6), %s210_s25, 64  }
  0x51   : > { %1659 = vsyncadd (%p1745_p6), %s210_s25, 4294967232  ;;  %s219_s21 = sand.u32 1, %s1727_s16   ;;  %s1131_s26 = sshll.u32 %s1834_s29, 9 }
  0x52   : > { %s220_s9 = scalar_lea.sflag [#allocation6], %s219_s21  ;;  %s1846_s6 = scalar_lea.vmem [#allocation5], %s1131_s26 }
  0x53   : > { %1661 = dma.done.wait (%p1745_p6), %s220_s9, 8320  }
  0x54   : > { %1663 = vsyncadd (%p1745_p6), %s220_s9, 4294958976  ;;  %v1407_v0 = vld [vmem:[%s1846_s6 + $0x38] sm:$0xff]  ;;  %v1406_v4 = vld [vmem:[%s1846_s6 + $0x30] sm:$0xff]  ;;  %vm276_vm0 = vcmask 1041409   ;;  %vm271_vm1 = vcmask 1040384   ;;  %vm280_vm2 = vcmask 1042434  }
  0x55   : > { %v1415_v1 = vld [vmem:[%s1846_s6 + $0x78] sm:$0xff]  ;;  %475 = vmatpush.bf16.msra.mxu0 %v1407_v0  ;;  %v1414_v5 = vld [vmem:[%s1846_s6 + $0x70] sm:$0xff]  ;;  %v1405_v8 = vld [vmem:[%s1846_s6 + $0x28] sm:$0xff]  ;;  %vm284_vm3 = vcmask 1043459   ;;  %s1132_s22 = sshll.u32 %s1834_s29, 3  ;;  %s1395_s19 = sshll.u32 %s1727_s16, 3 }
  0x56   : > { %v1423_v2 = vld [vmem:[%s1846_s6 + $0xb8] sm:$0xff]  ;;  %539 = vmatpush.bf16.msra.mxu1 %v1415_v1  ;;  %v1422_v6 = vld [vmem:[%s1846_s6 + $0xb0] sm:$0xff]  ;;  %v1413_v9 = vld [vmem:[%s1846_s6 + $0x68] sm:$0xff]  ;;  %s233_s17 = scalar_lea.vmem [#allocation7], %s1132_s22  ;;  %vm976_vm4 = vcmask 1044484   ;;  %s1000_s8 = scalar_lea.hbm %s1977_s3, %s1395_s19  ;;  %vm979_vm5 = vcmask 1045509  }
  0x57   : > { %v1431_v3 = vld [vmem:[%s1846_s6 + $0xf8] sm:$0xff]  ;;  %603 = vmatpush.bf16.msra.mxu2 %v1423_v2  ;;  %v1430_v7 = vld [vmem:[%s1846_s6 + $0xf0] sm:$0xff]  ;;  %v1421_v10 = vld [vmem:[%s1846_s6 + $0xa8] sm:$0xff]  ;;  %vm982_vm6 = vcmask 1046534   ;;  %s266_s16 = scalar_lea.vmem [#allocation8], %s1132_s22  ;;  %s1004_s10 = sshll.u32 %s1000_s8, 4  ;;  %s1005_s10 = int_to_ptr.hbm [resolvable:$true] %s1004_s10 }
  0x58   : > { %667 = vmatpush.bf16.msra.mxu3 %v1431_v3  ;;  %v1429_v11 = vld [vmem:[%s1846_s6 + $0xe8] sm:$0xff]  ;;  %v1404_v12 = vld [vmem:[%s1846_s6 + $0x20] sm:$0xff]  ;;  %v1869_v16 = vld [vmem:[%s1838_s11] sm:$0xf]  ;;  %s1002_s27 = sshll.u32 %s266_s16, 4  ;;  %vm985_vm7 = vcmask 1047559   ;;  %s1003_s27 = int_to_ptr.vmem [resolvable:$true] %s1002_s27 }
  0x59   : > { %476 = vmatpush.bf16.msra.mxu0 %v1406_v4  ;;  %v1412_v13 = vld [vmem:[%s1846_s6 + $0x60] sm:$0xff]  ;;  %v1403_v17 = vld [vmem:[%s1846_s6 + $0x18] sm:$0xff]  ;;  %v1874_v19 = vrot.slane %v1869_v16, 3  ;;  %v1402_v23 = vld [vmem:[%s1846_s6 + $0x10] sm:$0xff]  ;;  %s990_s20 = scalar_lea.sflag [#allocation4], %s1834_s29  ;;  %s1626_s28 = sshra.s32 %s1005_s10, 4  ;;  %s1627_s28 = int_to_ptr.hbm [resolvable:$true] %s1626_s28 }
  0x5a   : > { %540 = vmatpush.bf16.msra.mxu1 %v1414_v5  ;;  %v1420_v14 = vld [vmem:[%s1846_s6 + $0xa0] sm:$0xff]  ;;  %v1411_v18 = vld [vmem:[%s1846_s6 + $0x58] sm:$0xff]  ;;  %v1410_v24 = vld [vmem:[%s1846_s6 + $0x50] sm:$0xff]  ;;  %s1628_s7 = scalar_lea.hbm %s1627_s28, 8  ;;  %s1632_s25 = scalar_lea.hbm %s1977_s3, 16 }
  0x5b   : > { %604 = vmatpush.bf16.msra.mxu2 %v1422_v6  ;;  %v1428_v15 = vld [vmem:[%s1846_s6 + $0xe0] sm:$0xff]  ;;  %v1419_v20 = vld [vmem:[%s1846_s6 + $0x98] sm:$0xff]  ;;  %v277_v22 = vsel %vm276_vm0, %v1869_v16, %v1874_v19  ;;  %v1418_v26 = vld [vmem:[%s1846_s6 + $0x90] sm:$0xff]  ;;  %v274_v28 = vsel %vm271_vm1, %v1869_v16, %v1874_v19  ;;  %v281_v1 = vsel %vm280_vm2, %v1869_v16, %v1874_v19  ;;  %v285_v4 = vsel %vm284_vm3, %v1869_v16, %v1874_v19  ;;  %p1629_p6 = scmp.ne.s32.totalorder %s1627_s28, %s1628_s7  ;;  %p1633_p3 = scmp.lt.s32.totalorder %s1627_s28, %s1977_s3 }
  0x5c   : > { %668 = vmatpush.bf16.msra.mxu3 %v1430_v7  ;;  %v1427_v21 = vld [vmem:[%s1846_s6 + $0xd8] sm:$0xff]  ;;  %v279_v25 = vrot.slane %v277_v22, 1  ;;  %v1426_v27 = vld [vmem:[%s1846_s6 + $0xd0] sm:$0xff]  ;;  %v1401_v29 = vld [vmem:[%s1846_s6 + $0x8] sm:$0xff]  ;;  %v289_v34 = vunpack.i.h.s16 %v274_v28  ;;  %v1134_v41 = vpack.i.b16 %v274_v28, %v274_v28  ;;  %v283_v5 = vrot.slane %v281_v1, 2  ;;  %p1634_p4 = scmp.lt.s32.totalorder %s1632_s25, %s1628_s7 }
  0x5d   : > { %477 = vmatpush.bf16.msra.mxu0 %v1405_v8  ;;  %v1409_v30 = vld [vmem:[%s1846_s6 + $0x48] sm:$0xff]  ;;  %v1400_v35 = vld [vmem:[%s1846_s6] sm:$0xff]  ;;  %v1439_v43 = vld [vmem:[%s1846_s6 + $0x138] sm:$0xff]  ;;  %v287_v8 = vrot.slane %v285_v4, 3  ;;  %p1630_p13 = pnand %p1629_p6, %p1752_p11 }
  0x5e   : > { %541 = vmatpush.bf16.msra.mxu1 %v1413_v9  ;;  %v291_v31 = vunpack.i.h.s16 %v279_v25  ;;  %v1417_v32 = vld [vmem:[%s1846_s6 + $0x88] sm:$0xff]  ;;  %v1408_v36 = vld [vmem:[%s1846_s6 + $0x40] sm:$0xff]  ;;  %v1199_v37 = vpack.i.b16 %v279_v25, %v279_v25  ;;  %v488_v42 = vpack.i.b16 %v289_v34, %v289_v34  ;;  %v1447_v44 = vld [vmem:[%s1846_s6 + $0x178] sm:$0xff]  ;;  %v425_v49 = vperm.slane %v1134_v41, 0  ;;  %p1635_p0 = por %p1634_p4, %p1633_p3 }
  0x5f   : > { %605 = vmatpush.bf16.msra.mxu2 %v1421_v10  ;;  %v1425_v33 = vld [vmem:[%s1846_s6 + $0xc8] sm:$0xff]  ;;  %v1416_v39 = vld [vmem:[%s1846_s6 + $0x80] sm:$0xff]  ;;  %v1455_v45 = vld [vmem:[%s1846_s6 + $0x1b8] sm:$0xff]  ;;  %p1631_p2 = pneg %p1630_p13 }
  0x60   : > { %669 = vmatpush.bf16.msra.mxu3 %v1429_v11  ;;  %v616_v38 = vpack.i.b16 %v291_v31, %v291_v31  ;;  %v1424_v40 = vld [vmem:[%s1846_s6 + $0xc0] sm:$0xff]  ;;  %v1463_v46 = vld [vmem:[%s1846_s6 + $0x1f8] sm:$0xff]  ;;  %v553_v47 = vperm.slane %v1199_v37, 0  ;;  %v489_v50 = vperm.slane %v488_v42, 0  ;;  %v1438_v51 = vld [vmem:[%s1846_s6 + $0x130] sm:$0xff]  ;;  %v293_v11 = vunpack.i.h.s16 %v283_v5 }
  0x61   : > { %478 = vmatpush.bf16.msra.mxu0 %v1404_v12  ;;  %v1446_v52 = vld [vmem:[%s1846_s6 + $0x170] sm:$0xff]  ;;  %v1437_v55 = vld [vmem:[%s1846_s6 + $0x128] sm:$0xff]  ;;  %v1436_v59 = vld [vmem:[%s1846_s6 + $0x120] sm:$0xff]  ;;  %p1636_p5 = pnand %p1635_p0, %p1631_p2 }
  0x62   : > { %542 = vmatpush.bf16.msra.mxu1 %v1412_v13  ;;  %v617_v48 = vperm.slane %v616_v38, 0  ;;  %v1454_v53 = vld [vmem:[%s1846_s6 + $0x1b0] sm:$0xff]  ;;  %v1445_v56 = vld [vmem:[%s1846_s6 + $0x168] sm:$0xff]  ;;  %v1444_v60 = vld [vmem:[%s1846_s6 + $0x160] sm:$0xff] }
  0x63   : > { %606 = vmatpush.bf16.msra.mxu2 %v1420_v14  ;;  %v1462_v54 = vld [vmem:[%s1846_s6 + $0x1f0] sm:$0xff]  ;;  %v1453_v57 = vld [vmem:[%s1846_s6 + $0x1a8] sm:$0xff]  ;;  %v1452_v61 = vld [vmem:[%s1846_s6 + $0x1a0] sm:$0xff]  ;;  %v295_v14 = vunpack.i.h.s16 %v287_v8 }
  0x64   : > { %670 = vmatpush.bf16.msra.mxu3 %v1428_v15  ;;  %v1461_v58 = vld [vmem:[%s1846_s6 + $0x1e8] sm:$0xff]  ;;  %v1460_v62 = vld [vmem:[%s1846_s6 + $0x1e0] sm:$0xff]  ;;  %v1435_v63 = vld [vmem:[%s1846_s6 + $0x118] sm:$0xff] }
  0x65   : > { %479 = vmatpush.bf16.msra.mxu0 %v1403_v17  ;;  %v1443_v0 = vld [vmem:[%s1846_s6 + $0x158] sm:$0xff]  ;;  %v1434_v6 = vld [vmem:[%s1846_s6 + $0x110] sm:$0xff]  ;;  %v1433_v12 = vld [vmem:[%s1846_s6 + $0x108] sm:$0xff]  ;;  %v1264_v17 = vpack.i.b16 %v283_v5, %v283_v5  ;;  %v872_v22 = vpack.i.b16 %v295_v14, %v295_v14 }
  0x66   : > { %543 = vmatpush.bf16.msra.mxu1 %v1411_v18  ;;  %v1451_v2 = vld [vmem:[%s1846_s6 + $0x198] sm:$0xff]  ;;  %v1442_v7 = vld [vmem:[%s1846_s6 + $0x150] sm:$0xff]  ;;  %v1441_v13 = vld [vmem:[%s1846_s6 + $0x148] sm:$0xff]  ;;  %v744_v18 = vpack.i.b16 %v293_v11, %v293_v11 }
  0x67   : > { %607 = vmatpush.bf16.msra.mxu2 %v1419_v20  ;;  %v1459_v3 = vld [vmem:[%s1846_s6 + $0x1d8] sm:$0xff]  ;;  %v1450_v9 = vld [vmem:[%s1846_s6 + $0x190] sm:$0xff]  ;;  %v1449_v15 = vld [vmem:[%s1846_s6 + $0x188] sm:$0xff]  ;;  %v681_v25 = vperm.slane %v1264_v17, 0  ;;  %v873_v28 = vperm.slane %v872_v22, 0 }
  0x68   : > { %671 = vmatpush.bf16.msra.mxu3 %v1427_v21  ;;  %v1458_v10 = vld [vmem:[%s1846_s6 + $0x1d0] sm:$0xff]  ;;  %v1457_v16 = vld [vmem:[%s1846_s6 + $0x1c8] sm:$0xff]  ;;  %v1432_v19 = vld [vmem:[%s1846_s6 + $0x100] sm:$0xff]  ;;  %v1329_v21 = vpack.i.b16 %v287_v8, %v287_v8 }
  0x69   : > { %480 = vmatpush.bf16.msra.mxu0 %v1402_v23  ;;  %v1440_v20 = vld [vmem:[%s1846_s6 + $0x140] sm:$0xff] }
  0x6a   : > { %544 = vmatpush.bf16.msra.mxu1 %v1410_v24  ;;  %v1448_v23 = vld [vmem:[%s1846_s6 + $0x180] sm:$0xff] }
  0x6b   : > { %608 = vmatpush.bf16.msra.mxu2 %v1418_v26  ;;  %v1456_v24 = vld [vmem:[%s1846_s6 + $0x1c0] sm:$0xff]  ;;  %v745_v26 = vperm.slane %v744_v18, 0 }
  0x6c   : > { %672 = vmatpush.bf16.msra.mxu3 %v1426_v27  ;;  %v809_v27 = vperm.slane %v1329_v21, 0  ;;  %v936_v37 = vld [vmem:[%s233_s17] sm:$0xff] }
  0x6d   : > { %481 = vmatpush.bf16.msra.mxu0 %v1401_v29  ;;  %v938_v38 = vrot.slane %v936_v37, 1  ;;  %v940_v41 = vrot.slane %v936_v37, 3 }
  0x6e   : > { %545 = vmatpush.bf16.msra.mxu1 %v1409_v30 }
  0x6f   : > { %609 = vmatpush.bf16.msra.mxu2 %v1417_v32 }
  0x70   : > { %673 = vmatpush.bf16.msra.mxu3 %v1425_v33 }
  0x71   : > { %482 = vmatpush.bf16.msra.mxu0 %v1400_v35 }
  0x72   : > { %546 = vmatpush.bf16.msra.mxu1 %v1408_v36 }
  0x73   : > { %610 = vmatpush.bf16.msra.mxu2 %v1416_v39  ;;  %v939_v39 = vrot.slane %v936_v37, 2 }
  0x74   : > { %674 = vmatpush.bf16.msra.mxu3 %v1424_v40  ;;  %483 = vmatmul.bf16.vlgmr.msra.gmra.mxu0 %v425_v49 }
  0x75   : > { %731 = vmatpush.bf16.msrb.mxu0 %v1439_v43  ;;  %547 = vmatmul.bf16.vlgmr.msra.gmra.mxu1 %v489_v50 }
  0x76   : > { %795 = vmatpush.bf16.msrb.mxu1 %v1447_v44  ;;  %611 = vmatmul.bf16.vlgmr.msra.gmra.mxu2 %v553_v47  ;;  %v942_v47 = vrot.slane %v936_v37, 5 }
  0x77   : > { %859 = vmatpush.bf16.msrb.mxu2 %v1455_v45  ;;  %675 = vmatmul.bf16.vlgmr.msra.gmra.mxu3 %v617_v48  ;;  %v941_v45 = vrot.slane %v936_v37, 4 }
  0x78   : > { %923 = vmatpush.bf16.msrb.mxu3 %v1463_v46 }
  0x79   : > { %732 = vmatpush.bf16.msrb.mxu0 %v1438_v51 }
  0x7a   : > { %796 = vmatpush.bf16.msrb.mxu1 %v1446_v52 }
  0x7b   : > { %860 = vmatpush.bf16.msrb.mxu2 %v1454_v53 }
  0x7c   : > { %924 = vmatpush.bf16.msrb.mxu3 %v1462_v54 }
  0x7d   : > { %733 = vmatpush.bf16.msrb.mxu0 %v1437_v55 }
  0x7e   : > { %797 = vmatpush.bf16.msrb.mxu1 %v1445_v56 }
  0x7f   : > { %861 = vmatpush.bf16.msrb.mxu2 %v1453_v57  ;;  %v943_v57 = vrot.slane %v936_v37, 6 }
  0x80   : > { %925 = vmatpush.bf16.msrb.mxu3 %v1461_v58  ;;  %v944_v58 = vrot.slane %v936_v37, 7 }
  0x81   : > { %734 = vmatpush.bf16.msrb.mxu0 %v1436_v59 }
  0x82   : > { %798 = vmatpush.bf16.msrb.mxu1 %v1444_v60 }
  0x83   : > { %862 = vmatpush.bf16.msrb.mxu2 %v1452_v61 }
  0x84   : > { %926 = vmatpush.bf16.msrb.mxu3 %v1460_v62 }
  0x85   : > { %735 = vmatpush.bf16.msrb.mxu0 %v1435_v63 }
  0x86   : > { %799 = vmatpush.bf16.msrb.mxu1 %v1443_v0 }
  0x87   : > { %863 = vmatpush.bf16.msrb.mxu2 %v1451_v2 }
  0x88   : > { %927 = vmatpush.bf16.msrb.mxu3 %v1459_v3 }
  0x89   : > { %736 = vmatpush.bf16.msrb.mxu0 %v1434_v6 }
  0x8a   : > { %800 = vmatpush.bf16.msrb.mxu1 %v1442_v7 }
  0x8b   : > { %864 = vmatpush.bf16.msrb.mxu2 %v1450_v9 }
  0x8c   : > { %928 = vmatpush.bf16.msrb.mxu3 %v1458_v10 }
  0x8d   : > { %737 = vmatpush.bf16.msrb.mxu0 %v1433_v12 }
  0x8e   : > { %801 = vmatpush.bf16.msrb.mxu1 %v1441_v13 }
  0x8f   : > { %865 = vmatpush.bf16.msrb.mxu2 %v1449_v15 }
  0x90   : > { %929 = vmatpush.bf16.msrb.mxu3 %v1457_v16 }
  0x91   : > { %738 = vmatpush.bf16.msrb.mxu0 %v1432_v19 }
  0x92   : > { %802 = vmatpush.bf16.msrb.mxu1 %v1440_v20 }
  0x93   : > { %866 = vmatpush.bf16.msrb.mxu2 %v1448_v23 }
  0x94   : > { %930 = vmatpush.bf16.msrb.mxu3 %v1456_v24  ;;  %739 = vmatmul.bf16.vlgmr.msrb.gmra.mxu0 %v681_v25 }
  0x95   : > { %803 = vmatmul.bf16.vlgmr.msrb.gmra.mxu1 %v745_v26 }
  0x96   : > { %867 = vmatmul.bf16.vlgmr.msrb.gmra.mxu2 %v809_v27 }
  0x97   : > { %931 = vmatmul.bf16.vlgmr.msrb.gmra.mxu3 %v873_v28 }
  0xf1   : > { %v484_v29 = vpop.f32.mrf.mxu0 }
  0xf2   : > { %v548_v30 = vpop.f32.mrf.mxu1  ;;  %v953_v43 = vadd.f32 %v936_v37, %v484_v29 }
  0xf3   : > { %v954_v40 = vadd.f32 %v938_v38, %v548_v30 }
  0xf5   : > { %v969_v44 = vrot.slane %v954_v40, 7 }
  0xf7   : > { %v970_v51 = vsel %vm276_vm0, %v969_v44, %v953_v43 }
  0xf9   : > { %v612_v31 = vpop.f32.mrf.mxu2  ;;  %v486_v33 = vpop.f32.mrf.mxu0 }
  0xfa   : > { %v676_v32 = vpop.f32.mrf.mxu3  ;;  %v550_v34 = vpop.f32.mrf.mxu1  ;;  %v955_v42 = vadd.f32 %v939_v39, %v612_v31 }
  0xfb   : > { %v956_v46 = vadd.f32 %v940_v41, %v676_v32 }
  0xfc   : > { %v971_v48 = vrot.slane %v955_v42, 6 }
  0xfd   : > { %v973_v53 = vrot.slane %v956_v46, 5 }
  0xfe   : > { %v972_v55 = vsel %vm280_vm2, %v971_v48, %v970_v51 }
  0xff   : > { %v974_v59 = vsel %vm284_vm3, %v973_v53, %v972_v55 }
 0x101   : > { %v614_v35 = vpop.f32.mrf.mxu2 }
 0x102   : > { %v678_v36 = vpop.f32.mrf.mxu3 }
 0x111   : > { %v740_v49 = vpop.f32.mrf.mxu0 }
 0x112   : > { %v804_v50 = vpop.f32.mrf.mxu1  ;;  %v957_v52 = vadd.f32 %v941_v45, %v740_v49 }
 0x113   : > { %v958_v54 = vadd.f32 %v942_v47, %v804_v50 }
 0x114   : > { %v975_v56 = vrot.slane %v957_v52, 4 }
 0x115   : > { %v978_v60 = vrot.slane %v958_v54, 3 }
 0x116   : > { %v977_v63 = vsel %vm976_vm4, %v975_v56, %v974_v59 }
 0x117   : > { %v980_v6 = vsel %vm979_vm5, %v978_v60, %v977_v63 }
 0x119   : > { %v868_v61 = vpop.f32.mrf.mxu2  ;;  %v742_v2 = vpop.f32.mrf.mxu0 }
 0x11a   : > { %v932_v62 = vpop.f32.mrf.mxu3  ;;  %v959_v0 = vadd.f32 %v943_v57, %v868_v61  ;;  %v806_v3 = vpop.f32.mrf.mxu1 }
 0x11b   : > { %v960_v1 = vadd.f32 %v944_v58, %v932_v62 }
 0x11c   : > { %v981_v4 = vrot.slane %v959_v0, 2 }
 0x11d   : > { %v984_v5 = vrot.slane %v960_v1, 1 }
 0x11e   : > { %v983_v7 = vsel %vm982_vm6, %v981_v4, %v980_v6 }
 0x11f   : > { %v986_v8 = vsel %vm985_vm7, %v984_v5, %v983_v7 }
 0x120   : > { %988 = vst [vmem:[%s266_s16] sm:$0xff] %v986_v8 }
 0x121   : > { %v870_v9 = vpop.f32.mrf.mxu2 }
 0x122   : > { %v934_v10 = vpop.f32.mrf.mxu3 }
 0x123   : > { %1639 = shalt.err (!%p1636_p5)
}
 0x124   : > { %1470 = dma.vmem_to_hbm [thread:$0]  (%p1752_p11), %s1003_s27, 128, %s1005_s10, %s990_s20  }
 0x125 PF: > { %s1016_s29 = sand.u32 1, %s1670_s12   ;;  %p1483_p7 = pnand %p1120_p9, %p1756_p12 }
 0x126   : > { %s1017_s26 = scalar_lea.sflag [#allocation4], %s1016_s29 }
 0x127   : > { %p1484_p8 = pneg %p1483_p7 }
 0x129   : > { %1665 = dma.done.wait (%p1484_p8), %s1017_s26, 128  }
 0x12a   : > { %1667 = vsyncadd (%p1484_p8), %s1017_s26, 4294967168  ;;  %s1986_s9 = sld [smem:[#allocation12_spill]]  ;;  %p19_p10 = scmp.ge.s32.totalorder %s1731_s18, 4  }
 0x12b   : > { %s1987_s12 = smov %s1674_s13  ;;  %s1988_s13 = smov %s1678_s14 }
 0x12c   : > { %s1990_s15 = smov %s1731_s18  ;;  %21 = sbr.rel (!%p19_p10) target bundleno = 9 (0x9), region = 101 }
 0x130   : > { %s1989_s14 = smov %s1986_s9 }
 0x131   :  { %1023 = vsyncpa [#allocation3], 1 }
 0x132   :  { %1025 = vsyncpa [#allocation3 + $0x1], 1 }
 0x133   :  { %1026 = vsyncpa [#allocation6], 1 }
 0x134   :  { %1028 = vsyncpa [#allocation6 + $0x1], 1 }
 0x135   :  { %1029 = vsyncpa [#allocation4], 1 }
 0x136   :  { %1031 = vsyncpa [#allocation4 + $0x1], 1 }

</bundles_post_ra>
